<compile_context>
chip_gen: v6e
topology: v6e:2x2x1
jax: 0.10.0
libtpu: 0.0.40
codegen_flags: <defaults>
</compile_context>

<pallas_src>
import functools

import jax
import jax.numpy as jnp
from jax.experimental import pallas as pl
from jax.experimental.pallas import tpu as pltpu


def _round_up(x, m):
    return (x + m - 1) // m * m


def _venc_kernel(n_hidden, non_linear, sparse, log_alpha, z_dim,
                 x_ref, w_ref, b_ref, out_ref):
    """x_ref: (TILE_B, P) f32, zero-padded.
       w_ref: (n_hidden+1, P, P) bf16 slab (last slot = fused mu|logvar head).
       b_ref: (n_hidden+1, 1, P) f32 slab.
       out_ref: (TILE_B, P) f32; cols [0:z)=mu, [z:2z)=logvar."""
    h = x_ref[...].astype(jnp.float32)

    for i in range(n_hidden):
        w = w_ref[i]                       # (P, P) bf16, static slice
        b = b_ref[i]                       # (1, P) f32
        h = jnp.dot(h.astype(w.dtype), w,
                    preferred_element_type=jnp.float32) + b
        if non_linear:
            h = jnp.maximum(h, 0.0)

    w_head = w_ref[n_hidden]
    b_head = b_ref[n_hidden]
    head = jnp.dot(h.astype(w_head.dtype), w_head,
                   preferred_element_type=jnp.float32) + b_head

    if not sparse:
        # head = [mu | logvar | 0...]  -> write directly (lane-dense store).
        out = head
    else:
        # head = [mu | mu | 0...]; derive logvar from mu in-kernel.
        logvar = log_alpha + 2.0 * jnp.log(jnp.abs(head) + 1e-8)
        col = jax.lax.broadcasted_iota(jnp.int32, head.shape, 1)
        out = jnp.where(col < z_dim, head, logvar)

    out_ref[...] = out.astype(out_ref.dtype)


def _pack_params(input_dim, hidden_params, mu_params, logvar_params, z_dim,
                 sparse, matmul_dtype):
    """Pack all weights into one (L, P, P) slab and biases into (L, 1, P)."""
    hidden_dims = [w.shape[1] for w, _ in hidden_params]
    dims = [input_dim] + hidden_dims + [2 * z_dim]
    P = _round_up(max(dims), 128)
    L = len(hidden_params) + 1

    w_slab = jnp.zeros((L, P, P), jnp.float32)
    b_slab = jnp.zeros((L, 1, P), jnp.float32)
    for i, (w, b) in enumerate(hidden_params):
        w_slab = w_slab.at[i, :w.shape[0], :w.shape[1]].set(w)
        b_slab = b_slab.at[i, :, :b.shape[1]].set(b)

    w_mu, b_mu = mu_params
    if sparse:
        w_lv, b_lv = w_mu, b_mu            # duplicate mu; logvar made in-kernel
    else:
        w_lv, b_lv = logvar_params
    w_head = jnp.concatenate([w_mu, w_lv], axis=1)   # (hid_last, 2z)
    b_head = jnp.concatenate([b_mu, b_lv], axis=1)   # (1, 2z)
    w_slab = w_slab.at[L - 1, :w_head.shape[0], :w_head.shape[1]].set(w_head)
    b_slab = b_slab.at[L - 1, :, :b_head.shape[1]].set(b_head)

    return w_slab.astype(matmul_dtype), b_slab, P


def variational_encoder_forward(x, hidden_params, mu_params, logvar_params=None,
                                *, non_linear=True, sparse=False, log_alpha=0.0,
                                tile_b=128, matmul_dtype=jnp.bfloat16):
    """x: (B, input_dim); hidden_params: list of (W, b), W (in, out), b (1, out)."""
    B, input_dim = x.shape
    z_dim = mu_params[0].shape[1]
    n_hidden = len(hidden_params)

    w_slab, b_slab, P = _pack_params(input_dim, hidden_params, mu_params,
                                     logvar_params, z_dim, sparse, matmul_dtype)

    tile_b = min(tile_b, _round_up(B, 8))
    b_pad = _round_up(B, tile_b)
    x_pad = jnp.zeros((b_pad, P), jnp.float32).at[:B, :input_dim].set(
        x.astype(jnp.float32))

    kernel = functools.partial(_venc_kernel, n_hidden, non_linear, sparse,
                               float(log_alpha), z_dim)

    out = pl.pallas_call(
        kernel,
        out_shape=jax.ShapeDtypeStruct((b_pad, P), jnp.float32),
        grid=(b_pad // tile_b,),
        in_specs=[
            pl.BlockSpec((tile_b, P), lambda i: (i, 0)),           # x tile
            pl.BlockSpec((n_hidden + 1, P, P), lambda i: (0, 0, 0)),  # W slab
            pl.BlockSpec((n_hidden + 1, 1, P), lambda i: (0, 0, 0)),  # b slab
        ],
        out_specs=pl.BlockSpec((tile_b, P), lambda i: (i, 0)),
        compiler_params=pltpu.CompilerParams(
            dimension_semantics=("parallel",)),
    )(x_pad, w_slab, b_slab)

    mu = out[:B, :z_dim]
    logvar = out[:B, z_dim:2 * z_dim]
    return mu, logvar


def _ref_forward(x, hidden_params, mu_params, logvar_params, *, non_linear,
                 sparse, log_alpha, matmul_dtype=jnp.bfloat16):
    """Pure-JAX reference with the same bf16-operand / f32-accumulate matmuls."""
    def mm(a, w):
        return jnp.dot(a.astype(matmul_dtype), w.astype(matmul_dtype),
                       preferred_element_type=jnp.float32)
    h = x.astype(jnp.float32)
    for w, b in hidden_params:
        h = mm(h, w) + b
        if non_linear:
            h = jnp.maximum(h, 0.0)
    mu = mm(h, mu_params[0]) + mu_params[1]
    if sparse:
        logvar = log_alpha + 2.0 * jnp.log(jnp.abs(mu) + 1e-8)
    else:
        logvar = mm(h, logvar_params[0]) + logvar_params[1]
    return mu, logvar


def _init_linear(key, in_dim, out_dim):
    """Deterministic init mimicking nn.Linear default (uniform +/- 1/sqrt(in))."""
    kw, kb = jax.random.split(key)
    bound = 1.0 / jnp.sqrt(jnp.float32(in_dim))
    w = jax.random.uniform(kw, (in_dim, out_dim), jnp.float32, -bound, bound)
    b = jax.random.uniform(kb, (1, out_dim), jnp.float32, -bound, bound)
    return w, b


if __name__ == "__main__":
    # Module config: input_dim=32, hidden_layer_dim=[64, 32], z_dim=16,
    # non_linear=True, bias=True.
    input_dim = 32
    hidden_layer_dim = [64, 32]
    z_dim = 16
    batch = 8

    key = jax.random.PRNGKey(0)
    kx, k0, k1, kmu, klv = jax.random.split(key, 5)

    x = jax.random.normal(kx, (batch, input_dim), jnp.float32)

    layer_sizes = [input_dim] + hidden_layer_dim + [z_dim]
    hidden_params = [
        _init_linear(k0, layer_sizes[0], layer_sizes[1]),
        _init_linear(k1, layer_sizes[1], layer_sizes[2]),
    ]
    mu_params = _init_linear(kmu, layer_sizes[-2], layer_sizes[-1])
    logvar_params = _init_linear(klv, layer_sizes[-2], layer_sizes[-1])

    # --- sparse=False (two linear heads) ---
    mu, logvar = variational_encoder_forward(
        x, hidden_params, mu_params, logvar_params,
        non_linear=True, sparse=False)
    jax.block_until_ready((mu, logvar))

    mu_r, lv_r = _ref_forward(x, hidden_params, mu_params, logvar_params,
                              non_linear=True, sparse=False, log_alpha=0.0)
    assert mu.shape == (batch, z_dim) and logvar.shape == (batch, z_dim)
    assert jnp.allclose(mu, mu_r, atol=1e-4, rtol=1e-4)
    assert jnp.allclose(logvar, lv_r, atol=1e-4, rtol=1e-4)

    # --- sparse=True (logvar = log_alpha + 2*log(|mu|+1e-8), done in-kernel) ---
    log_alpha = -1.0
    mu_s, lv_s = variational_encoder_forward(
        x, hidden_params, mu_params, None,
        non_linear=True, sparse=True, log_alpha=log_alpha)
    jax.block_until_ready((mu_s, lv_s))

    mu_sr, lv_sr = _ref_forward(x, hidden_params, mu_params, None,
                                non_linear=True, sparse=True,
                                log_alpha=log_alpha)
    assert jnp.allclose(mu_s, mu_sr, atol=1e-4, rtol=1e-4)
    assert jnp.allclose(lv_s, lv_sr, atol=1e-2, rtol=1e-3)

    print("KERNEL_OK")
</pallas_src>

<mosaic_0001>
module attributes {stable_mosaic.version = 11 : i64} {
  func.func @_venc_kernel(%arg0: i32, %arg1: memref<8x128xf32, #tpu.memory_space<vmem>>, %arg2: memref<3x128x128xbf16, #tpu.memory_space<vmem>>, %arg3: memref<3x1x128xf32, #tpu.memory_space<vmem>>, %arg4: memref<8x128xf32, #tpu.memory_space<vmem>>) attributes {dimension_semantics = [#tpu.dimension_semantics<parallel>], iteration_bounds = array<i64: 1>, scalar_prefetch = 0 : i64, scratch_operands = 0 : i64, tpu.core_type = #tpu.core_type<tc>, window_params = [{transform_indices = @transform_0, window_bounds = array<i64: 8, 128>}, {pipeline_mode = #tpu.pipeline_mode<synchronous>, transform_indices = @transform_1, window_bounds = array<i64: 3, 128, 128>}, {pipeline_mode = #tpu.pipeline_mode<synchronous>, transform_indices = @transform_2, window_bounds = array<i64: 3, 1, 128>}, {transform_indices = @transform_3, window_bounds = array<i64: 8, 128>}]} {
    %c0 = arith.constant 0 : index
    %c0_0 = arith.constant 0 : index
    %0 = vector.load %arg1[%c0, %c0_0] : memref<8x128xf32, #tpu.memory_space<vmem>>, vector<8x128xf32>
    %c0_1 = arith.constant 0 : index
    %c0_2 = arith.constant 0 : index
    %c0_3 = arith.constant 0 : index
    %1 = vector.load %arg2[%c0_1, %c0_2, %c0_3] : memref<3x128x128xbf16, #tpu.memory_space<vmem>>, vector<1x128x128xbf16>
    %2 = vector.shape_cast %1 : vector<1x128x128xbf16> to vector<128x128xbf16>
    %c0_4 = arith.constant 0 : index
    %c0_5 = arith.constant 0 : index
    %c0_6 = arith.constant 0 : index
    %3 = vector.load %arg3[%c0_4, %c0_5, %c0_6] : memref<3x1x128xf32, #tpu.memory_space<vmem>>, vector<1x1x128xf32>
    %4 = vector.shape_cast %3 : vector<1x1x128xf32> to vector<1x128xf32>
    %5 = arith.truncf %0 : vector<8x128xf32> to vector<8x128xbf16>
    %cst = arith.constant dense<0.000000e+00> : vector<8x128xf32>
    %6 = tpu.matmul %5, %2, %cst {dimension_numbers = #tpu.dot_dimension_numbers<[1], [0], [0], [1], [0, 0, 1, 1], [], []>} : vector<8x128xbf16>, vector<128x128xbf16>, vector<8x128xf32> -> vector<8x128xf32>
    %7 = vector.broadcast %4 : vector<1x128xf32> to vector<8x128xf32>
    %8 = arith.addf %6, %7 : vector<8x128xf32>
    %cst_7 = arith.constant 0.000000e+00 : f32
    %9 = vector.broadcast %cst_7 : f32 to vector<8x128xf32>
    %10 = arith.maximumf %8, %9 : vector<8x128xf32>
    %c1 = arith.constant 1 : index
    %c0_8 = arith.constant 0 : index
    %c0_9 = arith.constant 0 : index
    %11 = vector.load %arg2[%c1, %c0_8, %c0_9] : memref<3x128x128xbf16, #tpu.memory_space<vmem>>, vector<1x128x128xbf16>
    %12 = vector.shape_cast %11 : vector<1x128x128xbf16> to vector<128x128xbf16>
    %c1_10 = arith.constant 1 : index
    %c0_11 = arith.constant 0 : index
    %c0_12 = arith.constant 0 : index
    %13 = vector.load %arg3[%c1_10, %c0_11, %c0_12] : memref<3x1x128xf32, #tpu.memory_space<vmem>>, vector<1x1x128xf32>
    %14 = vector.shape_cast %13 : vector<1x1x128xf32> to vector<1x128xf32>
    %15 = arith.truncf %10 : vector<8x128xf32> to vector<8x128xbf16>
    %cst_13 = arith.constant dense<0.000000e+00> : vector<8x128xf32>
    %16 = tpu.matmul %15, %12, %cst_13 {dimension_numbers = #tpu.dot_dimension_numbers<[1], [0], [0], [1], [0, 0, 1, 1], [], []>} : vector<8x128xbf16>, vector<128x128xbf16>, vector<8x128xf32> -> vector<8x128xf32>
    %17 = vector.broadcast %14 : vector<1x128xf32> to vector<8x128xf32>
    %18 = arith.addf %16, %17 : vector<8x128xf32>
    %cst_14 = arith.constant 0.000000e+00 : f32
    %19 = vector.broadcast %cst_14 : f32 to vector<8x128xf32>
    %20 = arith.maximumf %18, %19 : vector<8x128xf32>
    %c2 = arith.constant 2 : index
    %c0_15 = arith.constant 0 : index
    %c0_16 = arith.constant 0 : index
    %21 = vector.load %arg2[%c2, %c0_15, %c0_16] : memref<3x128x128xbf16, #tpu.memory_space<vmem>>, vector<1x128x128xbf16>
    %22 = vector.shape_cast %21 : vector<1x128x128xbf16> to vector<128x128xbf16>
    %c2_17 = arith.constant 2 : index
    %c0_18 = arith.constant 0 : index
    %c0_19 = arith.constant 0 : index
    %23 = vector.load %arg3[%c2_17, %c0_18, %c0_19] : memref<3x1x128xf32, #tpu.memory_space<vmem>>, vector<1x1x128xf32>
    %24 = vector.shape_cast %23 : vector<1x1x128xf32> to vector<1x128xf32>
    %25 = arith.truncf %20 : vector<8x128xf32> to vector<8x128xbf16>
    %cst_20 = arith.constant dense<0.000000e+00> : vector<8x128xf32>
    %26 = tpu.matmul %25, %22, %cst_20 {dimension_numbers = #tpu.dot_dimension_numbers<[1], [0], [0], [1], [0, 0, 1, 1], [], []>} : vector<8x128xbf16>, vector<128x128xbf16>, vector<8x128xf32> -> vector<8x128xf32>
    %27 = vector.broadcast %24 : vector<1x128xf32> to vector<8x128xf32>
    %28 = arith.addf %26, %27 : vector<8x128xf32>
    %c0_21 = arith.constant 0 : index
    %c0_22 = arith.constant 0 : index
    %29 = vector.load %arg4[%c0_21, %c0_22] : memref<8x128xf32, #tpu.memory_space<vmem>>, vector<8x128xf32>
    tpu.vector_store %arg4[%c0_21, %c0_22], %28 {strides = array<i32>} : memref<8x128xf32, #tpu.memory_space<vmem>>, vector<8x128xf32>,
    return
  }
  func.func @transform_0(%arg0: i32) -> (i32, i32) {
    %c0_i32 = arith.constant 0 : i32
    %c0_i32_0 = arith.constant 0 : i32
    return %arg0, %c0_i32 : i32, i32
  }
  func.func @transform_1(%arg0: i32) -> (i32, i32, i32) {
    %c0_i32 = arith.constant 0 : i32
    %c0_i32_0 = arith.constant 0 : i32
    %c0_i32_1 = arith.constant 0 : i32
    %c0_i32_2 = arith.constant 0 : i32
    return %c0_i32, %c0_i32_0, %c0_i32_1 : i32, i32, i32
  }
  func.func @transform_2(%arg0: i32) -> (i32, i32, i32) {
    %c0_i32 = arith.constant 0 : i32
    %c0_i32_0 = arith.constant 0 : i32
    %c0_i32_1 = arith.constant 0 : i32
    %c0_i32_2 = arith.constant 0 : i32
    return %c0_i32, %c0_i32_0, %c0_i32_1 : i32, i32, i32
  }
  func.func @transform_3(%arg0: i32) -> (i32, i32) {
    %c0_i32 = arith.constant 0 : i32
    %c0_i32_0 = arith.constant 0 : i32
    return %arg0, %c0_i32 : i32, i32
  }
}

</mosaic_0001>

<bundles_post_ra>
// kernel: tpu_custom_call.1
= control target key start
LH: loop header
LB: loop body
LE: loop exit
PB: predicated region body
PF: predicated region fallthrough
CT: control target
= control target key end

     0   :  { %8 = vsyncpa [#allocation3], 0  ;;  %s690_s0 = inlined_call_operand.hbm [shape: f32[8,128], index: 0, kind: input, shape index: {}]   ;;  %s691_s1 = inlined_call_operand.hbm [shape: bf16[3,128,128], index: 1, kind: input, shape index: {}]   ;;  %s692_s2 = inlined_call_operand.vmem [shape: f32[3,1,128], index: 2, kind: input, shape index: {}]   ;;  %s693_s3 = inlined_call_operand.hbm [shape: f32[8,128], index: 3, kind: output, shape index: {}]  }
   0x1   :  { %9 = vsyncpa [#allocation6], 0 }
   0x2   :  { %10 = vsyncpa [#allocation4], 0  ;;  %s615_s12 = smov [#allocation2]   ;;  %s616_s14 = smov [#allocation5]  }
   0x3   :  { %s17_s13 = sshll.u32 %s615_s12, 4  ;;  %s26_s15 = sshll.u32 %s616_s14, 4  ;;  %s18_s13 = int_to_ptr.vmem [resolvable:$true] %s17_s13  ;;  %s27_s15 = int_to_ptr.vmem [resolvable:$true] %s26_s15 }
   0x4   :  { %s557_s16 = scalar_lea.vmem %s18_s13, 128  ;;  %p562_p1 = scmp.lt.s32.totalorder %s18_s13, %s18_s13 }
   0x5   :  { %p558_p0 = scmp.ne.s32.totalorder %s18_s13, %s557_s16  ;;  %p563_p2 = scmp.lt.s32.totalorder %s557_s16, %s557_s16 }
   0x7   :  { %p564_p3 = por %p563_p2, %p562_p1 }
   0x9   :  { %p565_p4 = pnand %p564_p3, %p558_p0 }
   0xb   :  { %568 = shalt.err (!%p565_p4)
}
   0xc   :  { %20 = dma.hbm_to_vmem [thread:$0]  %s690_s0, 128, %s18_s13, [#allocation3]  }
   0xd   :  { %s577_s19 = scalar_lea.vmem %s27_s15, 3072  ;;  %p582_p6 = scmp.lt.s32.totalorder %s27_s15, %s27_s15 }
   0xe   :  { %p578_p5 = scmp.ne.s32.totalorder %s27_s15, %s577_s19  ;;  %p583_p7 = scmp.lt.s32.totalorder %s577_s19, %s577_s19 }
  0x10   :  { %p584_p8 = por %p583_p7, %p582_p6 }
  0x12   :  { %p585_p9 = pnand %p584_p8, %p578_p5 }
  0x14   :  { %588 = shalt.err (!%p585_p9)
}
  0x15   :  { %s617_s20 = smov 64   ;;  %s618_s21 = smov 4  }
  0x16   :  { %32 = dma.hbm_to_vmem [thread:$0]  %s691_s1, 3072, %s27_s15, [#allocation6], %s617_s20, %s617_s20, %s618_s21  }
  0x17   :  { %609 = dma.done.wait [#allocation3], 128  }
  0x18   :  { %610 = vsyncadd [#allocation3], 4294967168 }
  0x19   :  { %611 = dma.done.wait [#allocation6], 3072  }
  0x1a   :  { %612 = vsyncadd [#allocation6], 4294964224  ;;  %v619_v0 = vmov 0.0   ;;  %vm620_vm0 = vmmov 0   ;;  %v525_v1 = vld [vmem:[#allocation5 + $0x38] sm:$0xff]   ;;  %v526_v2 = vld [vmem:[#allocation5 + $0x30] sm:$0xff]  }
  0x1b   :  { %458 = vmatprep.subr.bf16.mxu0 %v619_v0  ;;  %474 = vmatprep.mubr.msk.bf16.mxu0 %vm620_vm0, %v619_v0  ;;  %v527_v3 = vld [vmem:[#allocation5 + $0x28] sm:$0xff]   ;;  %v533_v4 = vld [vmem:[#allocation5 + $0x78] sm:$0xff]   ;;  %v528_v5 = vld [vmem:[#allocation5 + $0x20] sm:$0xff]   ;;  %s621_s28 = smov [#allocation7]  }
  0x1c   :  { %478 = vmatprep.subr.bf16.mxu1 %v619_v0  ;;  %494 = vmatprep.mubr.msk.bf16.mxu1 %vm620_vm0, %v619_v0  ;;  %v534_v6 = vld [vmem:[#allocation5 + $0x70] sm:$0xff]   ;;  %v529_v7 = vld [vmem:[#allocation5 + $0x18] sm:$0xff]   ;;  %v535_v8 = vld [vmem:[#allocation5 + $0x68] sm:$0xff]   ;;  %s392_s29 = sshll.u32 %s621_s28, 4  ;;  %s393_s29 = int_to_ptr.vmem [resolvable:$true] %s392_s29 }
  0x1d   :  { %459 = vmatpush3.bf16.msra.mxu0 %v525_v1  ;;  %479 = vmatpush3.bf16.msra.mxu1 %v533_v4  ;;  %v530_v9 = vld [vmem:[#allocation5 + $0x10] sm:$0xff]   ;;  %v536_v10 = vld [vmem:[#allocation5 + $0x60] sm:$0xff]   ;;  %v531_v11 = vld [vmem:[#allocation5 + $0x8] sm:$0xff]   ;;  %s589_s30 = scalar_lea.vmem %s393_s29, 128  ;;  %p594_p11 = scmp.lt.s32.totalorder %s393_s29, %s393_s29 }
  0x1e   :  { %460 = vmatprep.subr.bf16.mxu0 %v619_v0  ;;  %480 = vmatprep.subr.bf16.mxu1 %v619_v0  ;;  %v537_v12 = vld [vmem:[#allocation5 + $0x58] sm:$0xff]   ;;  %v532_v13 = vld [vmem:[#allocation5] sm:$0xff]   ;;  %v538_v15 = vld [vmem:[#allocation5 + $0x50] sm:$0xff]   ;;  %p590_p10 = scmp.ne.s32.totalorder %s393_s29, %s589_s30  ;;  %p595_p12 = scmp.lt.s32.totalorder %s589_s30, %s589_s30 }
  0x1f   :  { %v42_v14 = vld [vmem:[#allocation2] sm:$0xff]  ;;  %v539_v17 = vld [vmem:[#allocation5 + $0x48] sm:$0xff]   ;;  %v540_v18 = vld [vmem:[#allocation5 + $0x40] sm:$0xff]  }
  0x20   :  { %v60_v16 = vpack.c.bf16 %v42_v14, %v42_v14  ;;  %v541_v19 = vld [vmem:[#allocation5 + $0xb8] sm:$0xff]   ;;  %v542_v20 = vld [vmem:[#allocation5 + $0xb0] sm:$0xff]   ;;  %v543_v21 = vld [vmem:[#allocation5 + $0xa8] sm:$0xff]   ;;  %p596_p13 = por %p595_p12, %p594_p11 }
  0x21   :  { %461 = vmatpush3.bf16.msra.mxu0 %v526_v2  ;;  %481 = vmatpush3.bf16.msra.mxu1 %v534_v6  ;;  %v544_v22 = vld [vmem:[#allocation5 + $0xa0] sm:$0xff]   ;;  %v545_v23 = vld [vmem:[#allocation5 + $0x98] sm:$0xff]   ;;  %v546_v24 = vld [vmem:[#allocation5 + $0x90] sm:$0xff]  }
  0x22   :  { %462 = vmatprep.subr.bf16.mxu0 %v619_v0  ;;  %482 = vmatprep.subr.bf16.mxu1 %v619_v0  ;;  %v402_v25 = vld [vmem:[%s692_s2] ss:$0 sm:$0xff]  ;;  %v547_v33 = vld [vmem:[#allocation5 + $0x88] sm:$0xff]   ;;  %v548_v34 = vld [vmem:[#allocation5 + $0x80] sm:$0xff]   ;;  %p597_p0 = pnand %p596_p13, %p590_p10 }
  0x23   :  { %v412_v35 = vld [vmem:[%s692_s2 + $0x1] ss:$0 sm:$0xff]  ;;  %v422_v43 = vld [vmem:[%s692_s2 + $0x2] ss:$0 sm:$0xff] }
  0x25   :  { %463 = vmatpush3.bf16.msra.mxu0 %v527_v3  ;;  %483 = vmatpush3.bf16.msra.mxu1 %v535_v8 }
  0x26   :  { %464 = vmatprep.subr.bf16.mxu0 %v619_v0  ;;  %484 = vmatprep.subr.bf16.mxu1 %v619_v0 }
  0x29   :  { %465 = vmatpush3.bf16.msra.mxu0 %v528_v5  ;;  %485 = vmatpush3.bf16.msra.mxu1 %v536_v10 }
  0x2a   :  { %466 = vmatprep.subr.bf16.mxu0 %v619_v0  ;;  %486 = vmatprep.subr.bf16.mxu1 %v619_v0 }
  0x2d   :  { %467 = vmatpush3.bf16.msra.mxu0 %v529_v7  ;;  %487 = vmatpush3.bf16.msra.mxu1 %v537_v12 }
  0x2e   :  { %468 = vmatprep.subr.bf16.mxu0 %v619_v0  ;;  %488 = vmatprep.subr.bf16.mxu1 %v619_v0 }
  0x31   :  { %469 = vmatpush3.bf16.msra.mxu0 %v530_v9  ;;  %489 = vmatpush3.bf16.msra.mxu1 %v538_v15 }
  0x32   :  { %470 = vmatprep.subr.bf16.mxu0 %v619_v0  ;;  %490 = vmatprep.subr.bf16.mxu1 %v619_v0 }
  0x35   :  { %471 = vmatpush3.bf16.msra.mxu0 %v531_v11  ;;  %491 = vmatpush3.bf16.msra.mxu1 %v539_v17 }
  0x36   :  { %472 = vmatprep.subr.bf16.mxu0 %v619_v0  ;;  %492 = vmatprep.subr.bf16.mxu1 %v619_v0 }
  0x39   :  { %473 = vmatpush3.bf16.msra.mxu0 %v532_v13  ;;  %493 = vmatpush3.bf16.msra.mxu1 %v540_v18 }
  0x3a   :  { %498 = vmatprep.subr.bf16.mxu0 %v619_v0 }
  0x3c   :  { %475 = vmatmul.mubr.bf16.vlgmr.msra.gmra.mxu0 %v60_v16 }
  0x3d   :  { %514 = vmatprep.mubr.msk.bf16.mxu0 %vm620_vm0, %v619_v0  ;;  %499 = vmatpush3.bf16.msra.mxu0 %v541_v19 }
  0x3e   :  { %500 = vmatprep.subr.bf16.mxu0 %v619_v0 }
  0x41   :  { %501 = vmatpush3.bf16.msra.mxu0 %v542_v20 }
  0x42   :  { %502 = vmatprep.subr.bf16.mxu0 %v619_v0 }
  0x45   :  { %503 = vmatpush3.bf16.msra.mxu0 %v543_v21 }
  0x46   :  { %504 = vmatprep.subr.bf16.mxu0 %v619_v0 }
  0x49   :  { %505 = vmatpush3.bf16.msra.mxu0 %v544_v22 }
  0x4a   :  { %506 = vmatprep.subr.bf16.mxu0 %v619_v0 }
  0x4d   :  { %507 = vmatpush3.bf16.msra.mxu0 %v545_v23 }
  0x4e   :  { %508 = vmatprep.subr.bf16.mxu0 %v619_v0 }
  0x51   :  { %509 = vmatpush3.bf16.msra.mxu0 %v546_v24 }
  0x52   :  { %510 = vmatprep.subr.bf16.mxu0 %v619_v0 }
  0x55   :  { %511 = vmatpush3.bf16.msra.mxu0 %v547_v33 }
  0x56   :  { %512 = vmatprep.subr.bf16.mxu0 %v619_v0 }
  0x59   :  { %513 = vmatpush3.bf16.msra.mxu0 %v548_v34 }
  0xfc   :  { %v149_v26 = vpop.f32.mrf.mxu0 }
  0xfd   :  { %v150_v27 = vadd.f32 %v402_v25, %v149_v26 }
  0xfe   :  { %v476_v28 = vpop.f32.mrf.mxu0 }
  0xff   :  { %v155_v29 = vmax.f32 %v150_v27, 0.0 }
 0x100   :  { %v152_v30 = vpop.f32.mrf.mxu0 }
 0x101   :  { %v175_v31 = vpack.c.bf16 %v155_v29, %v155_v29 }
 0x102   :  { %v477_v32 = vpop.f32.mrf.mxu0 }
 0x103   :  { %495 = vmatmul.mubr.bf16.vlgmr.msra.gmra.mxu1 %v175_v31 }
 0x1c3   :  { %v264_v36 = vpop.f32.mrf.mxu1 }
 0x1c4   :  { %v265_v37 = vadd.f32 %v412_v35, %v264_v36 }
 0x1c5   :  { %v496_v38 = vpop.f32.mrf.mxu1 }
 0x1c6   :  { %v270_v39 = vmax.f32 %v265_v37, 0.0 }
 0x1c7   :  { %v267_v40 = vpop.f32.mrf.mxu1 }
 0x1c8   :  { %v290_v41 = vpack.c.bf16 %v270_v39, %v270_v39 }
 0x1c9   :  { %v497_v42 = vpop.f32.mrf.mxu1 }
 0x1ca   :  { %515 = vmatmul.mubr.bf16.vlgmr.msra.gmra.mxu0 %v290_v41 }
 0x28a   :  { %v379_v44 = vpop.f32.mrf.mxu0 }
 0x28b   :  { %v380_v45 = vadd.f32 %v422_v43, %v379_v44 }
 0x28c   :  { %v516_v46 = vpop.f32.mrf.mxu0 }
 0x28d   :  { %385 = vst [vmem:[#allocation7] sm:$0xff] %v380_v45 }
 0x28e   :  { %v382_v47 = vpop.f32.mrf.mxu0 }
 0x28f   :  { %600 = shalt.err (!%p597_p0)
}
 0x290   :  { %395 = dma.vmem_to_hbm [thread:$0]  %s393_s29, 128, %s693_s3, [#allocation4]   ;;  %v517_v48 = vpop.f32.mrf.mxu0 }
 0x291   :  { %613 = dma.done.wait [#allocation4], 128  }
 0x292   :  { %614 = vsyncadd [#allocation4], 4294967168 }
 0x293   :  { %399 = vsyncpa [#allocation3], 1 }
 0x294   :  { %400 = vsyncpa [#allocation6], 1 }
 0x295   :  { %401 = vsyncpa [#allocation4], 1 }

</bundles_post_ra>
